<compile_context>
chip_gen: v7x
topology: tpu7x:2x2x1
jax: 0.10.0
libtpu: 0.0.40
codegen_flags: <defaults>
</compile_context>

<pallas_src>
import jax
import jax.numpy as jnp
from jax.experimental import pallas as pl
from jax.experimental.pallas import tpu as pltpu


def _round_up(n, m):
    return ((n + m - 1) // m) * m


def _choose_tile_b(B, tile_b):
    """Batch tile: multiple of 8, <= round_up(B, 8); for big batches keep >= 4
    grid steps (>= 2 per TensorCore on v7x) without dropping below 256 rows."""
    tb = min(tile_b, _round_up(B, 8))
    while tb >= 512 and pl.cdiv(B, tb) < 4:
        tb //= 2
    return max(tb, 8)


def actor_critic_kernel(x_ref, w1_ref, b1_ref, w2_ref, b2_ref, w3_ref, b3_ref,
                        o_ref):
    # x tile: (tile_b, F) f32; weights/biases resident f32 (constant index_maps).
    x = x_ref[...]

    # fc1 + bias + ReLU (f32 MXU matmul, f32 accumulation)
    h1 = jnp.dot(x, w1_ref[...], preferred_element_type=jnp.float32)
    h1 = jnp.maximum(h1 + b1_ref[...], 0.0)
    # dropout(p=0.25) -> identity in eval mode

    # fc2 + bias + ReLU
    h2 = jnp.dot(h1, w2_ref[...], preferred_element_type=jnp.float32)
    h2 = jnp.maximum(h2 + b2_ref[...], 0.0)
    # dropout(p=0.25) -> identity in eval mode

    # state_action_head (no activation); narrow (A-lane) store
    out = jnp.dot(h2, w3_ref[...], preferred_element_type=jnp.float32)
    o_ref[...] = (out + b3_ref[...]).astype(o_ref.dtype)


def actor_critic_forward(x, params, tile_b=1024):
    """Fused ActorCritic forward.  x: (B, num_features) f32.  Returns (B, A) f32."""
    w1, b1, w2, b2, w3, b3 = params
    B, F_ = x.shape
    H, H2, A = w1.shape[1], w2.shape[1], w3.shape[1]

    tile_b = _choose_tile_b(B, tile_b)
    grid = (pl.cdiv(B, tile_b),)  # ragged edge block handled by masked stores

    return pl.pallas_call(
        actor_critic_kernel,
        out_shape=jax.ShapeDtypeStruct((B, A), jnp.float32),
        grid=grid,
        in_specs=[
            # batch-tiled activations (pipelined along the grid); full last dim
            pl.BlockSpec((tile_b, F_), lambda i: (i, 0)),
            # weights / biases: constant index_map -> resident in VMEM
            pl.BlockSpec((F_, H), lambda i: (0, 0)),
            pl.BlockSpec((1, H), lambda i: (0, 0)),
            pl.BlockSpec((H, H2), lambda i: (0, 0)),
            pl.BlockSpec((1, H2), lambda i: (0, 0)),
            pl.BlockSpec((H2, A), lambda i: (0, 0)),
            pl.BlockSpec((1, A), lambda i: (0, 0)),
        ],
        out_specs=pl.BlockSpec((tile_b, A), lambda i: (i, 0)),
        compiler_params=pltpu.CompilerParams(
            # batch axis is embarrassingly parallel -> shard across v7x's 2 TCs
            dimension_semantics=("parallel",),
        ),
    )(x, w1, b1, w2, b2, w3, b3)


def init_params(key, num_features, num_actions, hidden_size):
    """Deterministic init mimicking nn.Linear default (uniform +/- 1/sqrt(fan_in)).

    Weights are stored as [in, out] (transposed vs. PyTorch's [out, in])."""
    h2 = hidden_size // 2
    ks = jax.random.split(key, 6)

    def lin(kw, kb, fan_in, fan_out):
        bound = 1.0 / jnp.sqrt(jnp.float32(fan_in))
        w = jax.random.uniform(kw, (fan_in, fan_out), jnp.float32, -bound, bound)
        b = jax.random.uniform(kb, (1, fan_out), jnp.float32, -bound, bound)
        return w, b

    w1, b1 = lin(ks[0], ks[1], num_features, hidden_size)
    w2, b2 = lin(ks[2], ks[3], hidden_size, h2)
    w3, b3 = lin(ks[4], ks[5], h2, num_actions)
    return (w1, b1, w2, b2, w3, b3)


def reference_forward(x, params):
    """Pure-f32 JAX reference (eval-mode dropout = identity)."""
    w1, b1, w2, b2, w3, b3 = params
    h1 = jnp.maximum(x @ w1 + b1, 0.0)
    h2 = jnp.maximum(h1 @ w2 + b2, 0.0)
    return h2 @ w3 + b3


if __name__ == "__main__":
    # Shapes consistent with the module's forward (synthetic data dims):
    num_features = 32   # factors.shape[1] + 1
    num_actions = 10    # fixed_shrk_data.shape[1] - 2
    hidden_size = 32

    key = jax.random.PRNGKey(0)
    k_x, k_p = jax.random.split(key)
    params = init_params(k_p, num_features, num_actions, hidden_size)

    # Multi-tile batch: exercises the batch grid (tile_b shrinks to 256 -> grid=(2,)).
    batch = 512
    x = jax.random.normal(k_x, (batch, num_features), jnp.float32)
    out = jax.block_until_ready(actor_critic_forward(x, params))
    ref = reference_forward(x, params)
    assert out.shape == (batch, num_actions)
    assert jnp.allclose(out, ref, atol=1e-3, rtol=1e-3), "mismatch vs reference"

    # Ragged batch (not a multiple of the tile): edge block with masked stores.
    x_ragged = x[:300]
    out_ragged = jax.block_until_ready(actor_critic_forward(x_ragged, params))
    assert out_ragged.shape == (300, num_actions)
    assert jnp.allclose(out_ragged, ref[:300], atol=1e-3, rtol=1e-3), \
        "ragged-batch mismatch vs reference"

    # Tiny batch: single 8-row tile, masked edge store.
    x_small = x[:6]
    out_small = jax.block_until_ready(actor_critic_forward(x_small, params))
    assert out_small.shape == (6, num_actions)
    assert jnp.allclose(out_small, ref[:6], atol=1e-3, rtol=1e-3), \
        "small-batch mismatch vs reference"

    print("KERNEL_OK")
</pallas_src>

<mosaic_0001>
module attributes {stable_mosaic.version = 11 : i64} {
  func.func @actor_critic_kernel(%arg0: i32, %arg1: memref<256x32xf32, #tpu.memory_space<vmem>>, %arg2: memref<32x32xf32, #tpu.memory_space<vmem>>, %arg3: memref<1x32xf32, #tpu.memory_space<vmem>>, %arg4: memref<32x16xf32, #tpu.memory_space<vmem>>, %arg5: memref<1x16xf32, #tpu.memory_space<vmem>>, %arg6: memref<16x10xf32, #tpu.memory_space<vmem>>, %arg7: memref<1x10xf32, #tpu.memory_space<vmem>>, %arg8: memref<256x10xf32, #tpu.memory_space<vmem>>) attributes {dimension_semantics = [#tpu.dimension_semantics<parallel>], iteration_bounds = array<i64: 2>, scalar_prefetch = 0 : i64, scratch_operands = 0 : i64, tpu.core_type = #tpu.core_type<tc>, window_params = [{transform_indices = @transform_0, window_bounds = array<i64: 256, 32>}, {pipeline_mode = #tpu.pipeline_mode<synchronous>, transform_indices = @transform_1, window_bounds = array<i64: 32, 32>}, {pipeline_mode = #tpu.pipeline_mode<synchronous>, transform_indices = @transform_2, window_bounds = array<i64: 1, 32>}, {pipeline_mode = #tpu.pipeline_mode<synchronous>, transform_indices = @transform_3, window_bounds = array<i64: 32, 16>}, {pipeline_mode = #tpu.pipeline_mode<synchronous>, transform_indices = @transform_4, window_bounds = array<i64: 1, 16>}, {pipeline_mode = #tpu.pipeline_mode<synchronous>, transform_indices = @transform_5, window_bounds = array<i64: 16, 10>}, {pipeline_mode = #tpu.pipeline_mode<synchronous>, transform_indices = @transform_6, window_bounds = array<i64: 1, 10>}, {transform_indices = @transform_7, window_bounds = array<i64: 256, 10>}]} {
    %c0 = arith.constant 0 : index
    %c0_0 = arith.constant 0 : index
    %0 = vector.load %arg1[%c0, %c0_0] : memref<256x32xf32, #tpu.memory_space<vmem>>, vector<256x32xf32>
    %c0_1 = arith.constant 0 : index
    %c0_2 = arith.constant 0 : index
    %1 = vector.load %arg2[%c0_1, %c0_2] : memref<32x32xf32, #tpu.memory_space<vmem>>, vector<32x32xf32>
    %cst = arith.constant dense<0.000000e+00> : vector<256x32xf32>
    %2 = tpu.matmul %0, %1, %cst {dimension_numbers = #tpu.dot_dimension_numbers<[1], [0], [0], [1], [0, 0, 1, 1], [], []>} : vector<256x32xf32>, vector<32x32xf32>, vector<256x32xf32> -> vector<256x32xf32>
    %c0_3 = arith.constant 0 : index
    %c0_4 = arith.constant 0 : index
    %3 = vector.load %arg3[%c0_3, %c0_4] : memref<1x32xf32, #tpu.memory_space<vmem>>, vector<1x32xf32>
    %4 = vector.broadcast %3 : vector<1x32xf32> to vector<256x32xf32>
    %5 = arith.addf %2, %4 : vector<256x32xf32>
    %cst_5 = arith.constant 0.000000e+00 : f32
    %6 = vector.broadcast %cst_5 : f32 to vector<256x32xf32>
    %7 = arith.maximumf %5, %6 : vector<256x32xf32>
    %c0_6 = arith.constant 0 : index
    %c0_7 = arith.constant 0 : index
    %8 = vector.load %arg4[%c0_6, %c0_7] : memref<32x16xf32, #tpu.memory_space<vmem>>, vector<32x16xf32>
    %cst_8 = arith.constant dense<0.000000e+00> : vector<256x16xf32>
    %9 = tpu.matmul %7, %8, %cst_8 {dimension_numbers = #tpu.dot_dimension_numbers<[1], [0], [0], [1], [0, 0, 1, 1], [], []>} : vector<256x32xf32>, vector<32x16xf32>, vector<256x16xf32> -> vector<256x16xf32>
    %c0_9 = arith.constant 0 : index
    %c0_10 = arith.constant 0 : index
    %10 = vector.load %arg5[%c0_9, %c0_10] : memref<1x16xf32, #tpu.memory_space<vmem>>, vector<1x16xf32>
    %11 = vector.broadcast %10 : vector<1x16xf32> to vector<256x16xf32>
    %12 = arith.addf %9, %11 : vector<256x16xf32>
    %cst_11 = arith.constant 0.000000e+00 : f32
    %13 = vector.broadcast %cst_11 : f32 to vector<256x16xf32>
    %14 = arith.maximumf %12, %13 : vector<256x16xf32>
    %c0_12 = arith.constant 0 : index
    %c0_13 = arith.constant 0 : index
    %15 = vector.load %arg6[%c0_12, %c0_13] : memref<16x10xf32, #tpu.memory_space<vmem>>, vector<16x10xf32>
    %cst_14 = arith.constant dense<0.000000e+00> : vector<256x10xf32>
    %16 = tpu.matmul %14, %15, %cst_14 {dimension_numbers = #tpu.dot_dimension_numbers<[1], [0], [0], [1], [0, 0, 1, 1], [], []>} : vector<256x16xf32>, vector<16x10xf32>, vector<256x10xf32> -> vector<256x10xf32>
    %c0_15 = arith.constant 0 : index
    %c0_16 = arith.constant 0 : index
    %17 = vector.load %arg7[%c0_15, %c0_16] : memref<1x10xf32, #tpu.memory_space<vmem>>, vector<1x10xf32>
    %18 = vector.broadcast %17 : vector<1x10xf32> to vector<256x10xf32>
    %19 = arith.addf %16, %18 : vector<256x10xf32>
    %c0_17 = arith.constant 0 : index
    %c0_18 = arith.constant 0 : index
    %20 = vector.load %arg8[%c0_17, %c0_18] : memref<256x10xf32, #tpu.memory_space<vmem>>, vector<256x10xf32>
    tpu.vector_store %arg8[%c0_17, %c0_18], %19 {strides = array<i32>} : memref<256x10xf32, #tpu.memory_space<vmem>>, vector<256x10xf32>,
    return
  }
  func.func @transform_0(%arg0: i32) -> (i32, i32) {
    %c0_i32 = arith.constant 0 : i32
    %c0_i32_0 = arith.constant 0 : i32
    return %arg0, %c0_i32 : i32, i32
  }
  func.func @transform_1(%arg0: i32) -> (i32, i32) {
    %c0_i32 = arith.constant 0 : i32
    %c0_i32_0 = arith.constant 0 : i32
    %c0_i32_1 = arith.constant 0 : i32
    return %c0_i32, %c0_i32_0 : i32, i32
  }
  func.func @transform_2(%arg0: i32) -> (i32, i32) {
    %c0_i32 = arith.constant 0 : i32
    %c0_i32_0 = arith.constant 0 : i32
    %c0_i32_1 = arith.constant 0 : i32
    return %c0_i32, %c0_i32_0 : i32, i32
  }
  func.func @transform_3(%arg0: i32) -> (i32, i32) {
    %c0_i32 = arith.constant 0 : i32
    %c0_i32_0 = arith.constant 0 : i32
    %c0_i32_1 = arith.constant 0 : i32
    return %c0_i32, %c0_i32_0 : i32, i32
  }
  func.func @transform_4(%arg0: i32) -> (i32, i32) {
    %c0_i32 = arith.constant 0 : i32
    %c0_i32_0 = arith.constant 0 : i32
    %c0_i32_1 = arith.constant 0 : i32
    return %c0_i32, %c0_i32_0 : i32, i32
  }
  func.func @transform_5(%arg0: i32) -> (i32, i32) {
    %c0_i32 = arith.constant 0 : i32
    %c0_i32_0 = arith.constant 0 : i32
    %c0_i32_1 = arith.constant 0 : i32
    return %c0_i32, %c0_i32_0 : i32, i32
  }
  func.func @transform_6(%arg0: i32) -> (i32, i32) {
    %c0_i32 = arith.constant 0 : i32
    %c0_i32_0 = arith.constant 0 : i32
    %c0_i32_1 = arith.constant 0 : i32
    return %c0_i32, %c0_i32_0 : i32, i32
  }
  func.func @transform_7(%arg0: i32) -> (i32, i32) {
    %c0_i32 = arith.constant 0 : i32
    %c0_i32_0 = arith.constant 0 : i32
    return %arg0, %c0_i32 : i32, i32
  }
}

</mosaic_0001>

<bundles_post_ra>
// kernel: tpu_custom_call.1
= control target key start
LH: loop header
LB: loop body
LE: loop exit
PB: predicated region body
PF: predicated region fallthrough
CT: control target
= control target key end

     0   :  { %s1923_s24 = smov 0   ;;  %s2296_s0 = inlined_call_operand.vmem [shape: f32[512,32], index: 0, kind: input, shape index: {}]   ;;  %s2297_s1 = inlined_call_operand.vmem [shape: f32[32,32], index: 1, kind: input, shape index: {}]   ;;  %s2298_s2 = inlined_call_operand.vmem [shape: f32[1,32], index: 2, kind: input, shape index: {}]   ;;  %s2299_s3 = inlined_call_operand.vmem [shape: f32[32,16], index: 3, kind: input, shape index: {}]   ;;  %s2300_s4 = inlined_call_operand.vmem [shape: f32[1,16], index: 4, kind: input, shape index: {}]   ;;  %s2301_s5 = inlined_call_operand.vmem [shape: f32[16,10], index: 5, kind: input, shape index: {}]   ;;  %s2302_s6 = inlined_call_operand.vmem [shape: f32[1,10], index: 6, kind: input, shape index: {}]   ;;  %s2303_s7 = inlined_call_operand.vmem [shape: f32[512,10], index: 7, kind: output, shape index: {}]  }
   0x1 LB: > { %s1463_s25 = sadd.s32 4294967295, %s1881_s24   ;;  %p1467_p0 = scmp.ge.s32.totalorder %s1881_s24, 1  ;;  %s1881_s24 = sphi %s1923_s24, %s17_s24  }
   0x2   : > { %p238_p1 = scmp.lt.s32.totalorder %s1881_s24, 3 }
   0x4   : > { %p239_p2 = pnand %p1467_p0, %p238_p1 }
   0x5   : > { %v314_v0 = vld [vmem:[%s2297_s1] sm:$0xff] (!%p239_p2)  ;;  %v315_v1 = vld [vmem:[%s2297_s1 + $0x8] sm:$0xff] (!%p239_p2)  ;;  %v316_v2 = vld [vmem:[%s2297_s1 + $0x10] sm:$0xff] (!%p239_p2)  ;;  %s1468_s9 = sshll.u32 (!%p239_p2), %s1463_s25, 5  ;;  %vm325_vm0 = vcmask (!%p239_p2), 261120   ;;  %vm1052_vm1 = vcmask (!%p239_p2), 130048  }
   0x6   : > { %242 = sbr.rel (%p239_p2) target bundleno = 730 (0x2da), region = 48  ;;  %v1843_v3 = vpack.c.bf16 (!%p239_p2), %v315_v1, %v314_v0  ;;  %v317_v4 = vld [vmem:[%s2297_s1 + $0x18] sm:$0xff] (!%p239_p2)  ;;  %p271_p3 = scmp.lt.s32.totalorder (!%p239_p2), %s1468_s9, 63  ;;  %v679_v6 = vld [vmem:[%s2299_s3] sm:$0xff] (!%p239_p2)  ;;  %v680_v7 = vld [vmem:[%s2299_s3 + $0x8] sm:$0xff] (!%p239_p2)  ;;  %vm1374_vm2 = vcmask (!%p239_p2), 80896  }
   0x7   : > { %v1847_v5 = vpack.c.bf16 (!%p239_p2), %v317_v4, %v316_v2  ;;  %v1851_v8 = vpack.c.bf16 (!%p239_p2), %v680_v7, %v679_v6  ;;  %v681_v12 = vld [vmem:[%s2299_s3 + $0x10] sm:$0xff] (!%p239_p2)  ;;  %v682_v13 = vld [vmem:[%s2299_s3 + $0x18] sm:$0xff] (!%p239_p2)  ;;  %v1043_v44 = vld [vmem:[%s2301_s5] sm:$0xff] (!%p239_p2) }
   0x8   : > { %1844 = vmatprep.subr.bf16.mxu0 (!%p239_p2), %v1843_v3  ;;  %1863 = vmatprep.subr.bf16.mxu1 (!%p239_p2), %v1843_v3  ;;  %v1855_v19 = vpack.c.bf16 (!%p239_p2), %v682_v13, %v681_v12  ;;  %v1044_v45 = vld [vmem:[%s2301_s5 + $0x8] sm:$0xff] (!%p239_p2)  ;;  %v2038_v47 = vld [vmem:[%s2298_s2] ss:$0 sm:$0xff] (!%p239_p2) }
   0x9   : > { %1846 = vmatpush3.bf16.msra.mxu0 (!%p239_p2), %v1843_v3  ;;  %1865 = vmatpush3.bf16.msra.mxu1 (!%p239_p2), %v1843_v3  ;;  %v1859_v46 = vpack.c.bf16 (!%p239_p2), %v1044_v45, %v1043_v44 }
   0xa   : > { %1848 = vmatprep.subr.bf16.mxu0 (!%p239_p2), %v1847_v5  ;;  %1864 = vmatprep.subr.bf16.mxu1 (!%p239_p2), %v1847_v5 }
   0xd   : > { %s2305_s9 = smov (!%p271_p3, %s1468_s9), 63  ;;  %1850 = vmatpush3.bf16.msra.mxu0 %v1847_v5  ;;  %1866 = vmatpush3.bf16.msra.mxu1 %v1847_v5 }
   0xe   : > { %s1469_s16 = sshll.u32 %s2305_s9, 3  ;;  %1852 = vmatprep.subr.bf16.mxu1 %v1851_v8  ;;  %1860 = vmatprep.subr.bf16.mxu0 %v1859_v46 }
   0xf   : > { %s1957_s19 = scalar_lea.vmem %s2296_s0, %s1469_s16  ;;  %s2195_s15 = scalar_lea.vmem %s2303_s7, %s1469_s16 }
  0x10   : > { %v282_v9 = vld [vmem:[%s1957_s19] sm:$0xff]  ;;  %v283_v10 = vld [vmem:[%s1957_s19 + $0x8] sm:$0xff]  ;;  %v284_v11 = vld [vmem:[%s1957_s19 + $0x10] sm:$0xff] }
  0x11   : > { %1687 = vmatprep.mubr.msk.f32.mxu0 %vm325_vm0, %v282_v9  ;;  %v285_v14 = vld [vmem:[%s1957_s19 + $0x18] sm:$0xff]  ;;  %v298_v15 = vld [vmem:[%s1957_s19 + $0x80] sm:$0xff]  ;;  %v299_v16 = vld [vmem:[%s1957_s19 + $0x88] sm:$0xff] }
  0x12   : > { %1688 = vmatmul.mubr.msk.f32.vlgmr.msra.gmra.mrb[0].mxu0 %vm325_vm0, %v283_v10  ;;  %v286_v17 = vld [vmem:[%s1957_s19 + $0x20] sm:$0xff]  ;;  %1711 = vmatprep.mubr.msk.f32.mxu1 %vm325_vm0, %v298_v15  ;;  %v300_v18 = vld [vmem:[%s1957_s19 + $0x90] sm:$0xff]  ;;  %v301_v20 = vld [vmem:[%s1957_s19 + $0x98] sm:$0xff] }
  0x13   : > { %1690 = vmatprep.mubr.msk.f32.mxu0 %vm325_vm0, %v284_v11  ;;  %1712 = vmatmul.mubr.msk.f32.vlgmr.msra.gmra.mrb[0].mxu1 %vm325_vm0, %v299_v16  ;;  %v287_v21 = vld [vmem:[%s1957_s19 + $0x28] sm:$0xff]  ;;  %v302_v22 = vld [vmem:[%s1957_s19 + $0xa0] sm:$0xff]  ;;  %v288_v23 = vld [vmem:[%s1957_s19 + $0x30] sm:$0xff] }
  0x14   : > { %1714 = vmatprep.mubr.msk.f32.mxu1 %vm325_vm0, %v300_v18  ;;  %1854 = vmatpush3.bf16.msra.mxu1 %v1851_v8  ;;  %v303_v24 = vld [vmem:[%s1957_s19 + $0xa8] sm:$0xff]  ;;  %v289_v25 = vld [vmem:[%s1957_s19 + $0x38] sm:$0xff]  ;;  %v304_v26 = vld [vmem:[%s1957_s19 + $0xb0] sm:$0xff] }
  0x15   : > { %1856 = vmatprep.subr.bf16.mxu1 %v1855_v19  ;;  %v290_v27 = vld [vmem:[%s1957_s19 + $0x40] sm:$0xff]  ;;  %v305_v28 = vld [vmem:[%s1957_s19 + $0xb8] sm:$0xff]  ;;  %v291_v29 = vld [vmem:[%s1957_s19 + $0x48] sm:$0xff]  ;;  %1862 = vmatpush3.bf16.msra.mxu0 %v1859_v46 }
  0x16   : > { %1691 = vmatmul.mubr.msk.f32.gmra.mrb[2].mxu0 %vm325_vm0, %v285_v14  ;;  %v306_v30 = vld [vmem:[%s1957_s19 + $0xc0] sm:$0xff]  ;;  %v292_v31 = vld [vmem:[%s1957_s19 + $0x50] sm:$0xff]  ;;  %v307_v32 = vld [vmem:[%s1957_s19 + $0xc8] sm:$0xff] }
  0x17   : > { %1693 = vmatprep.mubr.msk.f32.mxu0 %vm325_vm0, %v286_v17  ;;  %1715 = vmatmul.mubr.msk.f32.gmra.mrb[2].mxu1 %vm325_vm0, %v301_v20  ;;  %v293_v33 = vld [vmem:[%s1957_s19 + $0x58] sm:$0xff]  ;;  %v308_v34 = vld [vmem:[%s1957_s19 + $0xd0] sm:$0xff]  ;;  %v294_v35 = vld [vmem:[%s1957_s19 + $0x60] sm:$0xff] }
  0x18   : > { %1717 = vmatprep.mubr.msk.f32.mxu1 %vm325_vm0, %v302_v22  ;;  %1858 = vmatpush3.bf16.msra.mxu1 %v1855_v19  ;;  %v309_v36 = vld [vmem:[%s1957_s19 + $0xd8] sm:$0xff]  ;;  %v295_v37 = vld [vmem:[%s1957_s19 + $0x68] sm:$0xff]  ;;  %v310_v38 = vld [vmem:[%s1957_s19 + $0xe0] sm:$0xff] }
  0x19   : > { %v296_v39 = vld [vmem:[%s1957_s19 + $0x70] sm:$0xff]  ;;  %v311_v40 = vld [vmem:[%s1957_s19 + $0xe8] sm:$0xff]  ;;  %v297_v41 = vld [vmem:[%s1957_s19 + $0x78] sm:$0xff] }
  0x1a   : > { %1694 = vmatmul.mubr.msk.f32.gmra.mrb[4].mxu0 %vm325_vm0, %v287_v21  ;;  %v312_v42 = vld [vmem:[%s1957_s19 + $0xf0] sm:$0xff]  ;;  %v313_v43 = vld [vmem:[%s1957_s19 + $0xf8] sm:$0xff] }
  0x1b   : > { %1696 = vmatprep.mubr.msk.f32.mxu0 %vm325_vm0, %v288_v23  ;;  %1718 = vmatmul.mubr.msk.f32.gmra.mrb[4].mxu1 %vm325_vm0, %v303_v24 }
  0x1c   : > { %1720 = vmatprep.mubr.msk.f32.mxu1 %vm325_vm0, %v304_v26 }
  0x1e   : > { %1697 = vmatmul.mubr.msk.f32.gmra.mrb[6].mxu0 %vm325_vm0, %v289_v25 }
  0x1f   : > { %1699 = vmatprep.mubr.msk.f32.mxu0 %vm325_vm0, %v290_v27  ;;  %1721 = vmatmul.mubr.msk.f32.gmra.mrb[6].mxu1 %vm325_vm0, %v305_v28 }
  0x20   : > { %1723 = vmatprep.mubr.msk.f32.mxu1 %vm325_vm0, %v306_v30 }
  0x22   : > { %1700 = vmatmul.mubr.msk.f32.gmra.mrb[8].mxu0 %vm325_vm0, %v291_v29 }
  0x23   : > { %1702 = vmatprep.mubr.msk.f32.mxu0 %vm325_vm0, %v292_v31  ;;  %1724 = vmatmul.mubr.msk.f32.gmra.mrb[8].mxu1 %vm325_vm0, %v307_v32 }
  0x24   : > { %1726 = vmatprep.mubr.msk.f32.mxu1 %vm325_vm0, %v308_v34 }
  0x26   : > { %1703 = vmatmul.mubr.msk.f32.gmra.mrb[10].mxu0 %vm325_vm0, %v293_v33 }
  0x27   : > { %1705 = vmatprep.mubr.msk.f32.mxu0 %vm325_vm0, %v294_v35  ;;  %1727 = vmatmul.mubr.msk.f32.gmra.mrb[10].mxu1 %vm325_vm0, %v309_v36 }
  0x28   : > { %1729 = vmatprep.mubr.msk.f32.mxu1 %vm325_vm0, %v310_v38 }
  0x2a   : > { %1706 = vmatmul.mubr.msk.f32.gmra.mrb[12].mxu0 %vm325_vm0, %v295_v37 }
  0x2b   : > { %1708 = vmatprep.mubr.msk.f32.mxu0 %vm325_vm0, %v296_v39  ;;  %1730 = vmatmul.mubr.msk.f32.gmra.mrb[12].mxu1 %vm325_vm0, %v311_v40 }
  0x2c   : > { %1732 = vmatprep.mubr.msk.f32.mxu1 %vm325_vm0, %v312_v42 }
  0x2e   : > { %1709 = vmatmul.mubr.msk.f32.gmra.mrb[14].mxu0 %vm325_vm0, %v297_v41 }
  0x2f   : > { %1733 = vmatmul.mubr.msk.f32.gmra.mrb[14].mxu1 %vm325_vm0, %v313_v43 }
  0xe5   : > { %v1689_v48 = vpop.f32.mrb[0].mxu0 }
  0xe6   : > { %v494_v49 = vadd.f32 %v1689_v48, %v2038_v47  ;;  %v488_v50 = vpop.f32.mrb[1].mxu0  ;;  %v2042_v52 = vpop.f32.mrb[0].mxu1 }
  0xe7   : > { %v489_v51 = vadd.f32 %v2038_v47, %v488_v50  ;;  %v568_v55 = vpop.f32.mrb[1].mxu1 }
  0xe8   : > { %v648_v56 = vmax.f32 %v494_v49, 0.0  ;;  %v569_v39 = vadd.f32 %v2038_v47, %v568_v55 }
  0xe9   : > { %v647_v53 = vmax.f32 %v489_v51, 0.0  ;;  %v1692_v54 = vpop.f32.mrb[2].mxu0 }
  0xea   : > { %v504_v57 = vadd.f32 %v1692_v54, %v2038_v47  ;;  %v498_v58 = vpop.f32.mrb[3].mxu0  ;;  %v2048_v60 = vpop.f32.mrb[2].mxu1  ;;  %v663_v48 = vmax.f32 %v569_v39, 0.0 }
  0xeb   : > { %v499_v59 = vadd.f32 %v2038_v47, %v498_v58  ;;  %1743 = vmatprep.mubr.msk.f32.mxu1 %vm325_vm0, %v647_v53  ;;  %v578_v63 = vpop.f32.mrb[3].mxu1  ;;  %v574_v53 = vadd.f32 %v2042_v52, %v2038_v47 }
  0xec   : > { %1744 = vmatmul.mubr.msk.f32.vlgmr.msra.gmra.mrb[16].mxu1 %vm325_vm0, %v648_v56  ;;  %v650_v0 = vmax.f32 %v504_v57, 0.0  ;;  %v579_v49 = vadd.f32 %v2038_v47, %v578_v63  ;;  %v584_v57 = vadd.f32 %v2048_v60, %v2038_v47 }
  0xed   : > { %v649_v61 = vmax.f32 %v499_v59, 0.0  ;;  %v1695_v62 = vpop.f32.mrb[4].mxu0  ;;  %v664_v56 = vmax.f32 %v574_v53, 0.0 }
  0xee   : > { %v514_v1 = vadd.f32 %v1695_v62, %v2038_v47  ;;  %v508_v2 = vpop.f32.mrb[5].mxu0  ;;  %v2054_v4 = vpop.f32.mrb[4].mxu1  ;;  %v665_v54 = vmax.f32 %v579_v49, 0.0  ;;  %v666_v59 = vmax.f32 %v584_v57, 0.0 }
  0xef   : > { %v509_v3 = vadd.f32 %v2038_v47, %v508_v2  ;;  %1746 = vmatprep.mubr.msk.f32.mxu1 %vm325_vm0, %v649_v61  ;;  %v588_v7 = vpop.f32.mrb[5].mxu1  ;;  %v594_v61 = vadd.f32 %v2054_v4, %v2038_v47 }
  0xf0   : > { %1747 = vmatmul.mubr.msk.f32.gmra.mrb[18].mxu1 %vm325_vm0, %v650_v0  ;;  %v652_v8 = vmax.f32 %v514_v1, 0.0  ;;  %v589_v55 = vadd.f32 %v2038_v47, %v588_v7 }
  0xf1   : > { %v651_v5 = vmax.f32 %v509_v3, 0.0  ;;  %v1698_v6 = vpop.f32.mrb[6].mxu0  ;;  %v668_v0 = vmax.f32 %v594_v61, 0.0 }
  0xf2   : > { %v524_v9 = vadd.f32 %v1698_v6, %v2038_v47  ;;  %v518_v10 = vpop.f32.mrb[7].mxu0  ;;  %v2060_v12 = vpop.f32.mrb[6].mxu1  ;;  %v667_v58 = vmax.f32 %v589_v55, 0.0 }
  0xf3   : > { %v519_v11 = vadd.f32 %v2038_v47, %v518_v10  ;;  %1749 = vmatprep.mubr.msk.f32.mxu1 %vm325_vm0, %v651_v5  ;;  %v598_v15 = vpop.f32.mrb[7].mxu1  ;;  %v604_v60 = vadd.f32 %v2060_v12, %v2038_v47 }
  0xf4   : > { %1750 = vmatmul.mubr.msk.f32.gmra.mrb[20].mxu1 %vm325_vm0, %v652_v8  ;;  %v654_v16 = vmax.f32 %v524_v9, 0.0  ;;  %v599_v52 = vadd.f32 %v2038_v47, %v598_v15 }
  0xf5   : > { %v653_v13 = vmax.f32 %v519_v11, 0.0  ;;  %v1701_v14 = vpop.f32.mrb[8].mxu0  ;;  %v670_v3 = vmax.f32 %v604_v60, 0.0 }
  0xf6   : > { %v534_v17 = vadd.f32 %v1701_v14, %v2038_v47  ;;  %v528_v18 = vpop.f32.mrb[9].mxu0  ;;  %v1725_v20 = vpop.f32.mrb[8].mxu1  ;;  %v669_v62 = vmax.f32 %v599_v52, 0.0 }
  0xf7   : > { %v529_v19 = vadd.f32 %v2038_v47, %v528_v18  ;;  %1752 = vmatprep.mubr.msk.f32.mxu1 %vm325_vm0, %v653_v13  ;;  %v608_v23 = vpop.f32.mrb[9].mxu1  ;;  %v614_v4 = vadd.f32 %v1725_v20, %v2038_v47 }
  0xf8   : > { %1753 = vmatmul.mubr.msk.f32.gmra.mrb[22].mxu1 %vm325_vm0, %v654_v16  ;;  %v656_v24 = vmax.f32 %v534_v17, 0.0  ;;  %v609_v63 = vadd.f32 %v2038_v47, %v608_v23  ;;  %v2119_v17 = vld [vmem:[%s2300_s4] ss:$0 sm:$0xff] }
  0xf9   : > { %v655_v21 = vmax.f32 %v529_v19, 0.0  ;;  %v1704_v22 = vpop.f32.mrb[10].mxu0  ;;  %v672_v7 = vmax.f32 %v614_v4, 0.0 }
  0xfa   : > { %v544_v25 = vadd.f32 %v1704_v22, %v2038_v47  ;;  %v538_v26 = vpop.f32.mrb[11].mxu0  ;;  %v1728_v28 = vpop.f32.mrb[10].mxu1  ;;  %v671_v1 = vmax.f32 %v609_v63, 0.0 }
  0xfb   : > { %v539_v27 = vadd.f32 %v2038_v47, %v538_v26  ;;  %1755 = vmatprep.mubr.msk.f32.mxu1 %vm325_vm0, %v655_v21  ;;  %v618_v31 = vpop.f32.mrb[11].mxu1  ;;  %v624_v8 = vadd.f32 %v1728_v28, %v2038_v47 }
  0xfc   : > { %1756 = vmatmul.mubr.msk.f32.gmra.mrb[24].mxu1 %vm325_vm0, %v656_v24  ;;  %v658_v32 = vmax.f32 %v544_v25, 0.0  ;;  %v619_v2 = vadd.f32 %v2038_v47, %v618_v31 }
  0xfd   : > { %v657_v29 = vmax.f32 %v539_v27, 0.0  ;;  %v1707_v30 = vpop.f32.mrb[12].mxu0  ;;  %v674_v11 = vmax.f32 %v624_v8, 0.0 }
  0xfe   : > { %v554_v33 = vadd.f32 %v1707_v30, %v2038_v47  ;;  %v548_v34 = vpop.f32.mrb[13].mxu0  ;;  %v1731_v36 = vpop.f32.mrb[12].mxu1  ;;  %v673_v5 = vmax.f32 %v619_v2, 0.0 }
  0xff   : > { %v549_v35 = vadd.f32 %v2038_v47, %v548_v34  ;;  %1758 = vmatprep.mubr.msk.f32.mxu1 %vm325_vm0, %v657_v29  ;;  %v628_v40 = vpop.f32.mrb[13].mxu1  ;;  %v634_v12 = vadd.f32 %v1731_v36, %v2038_v47 }
 0x100   : > { %1759 = vmatmul.mubr.msk.f32.gmra.mrb[26].mxu1 %vm325_vm0, %v658_v32  ;;  %v660_v41 = vmax.f32 %v554_v33, 0.0  ;;  %v629_v6 = vadd.f32 %v2038_v47, %v628_v40 }
 0x101   : > { %v659_v37 = vmax.f32 %v549_v35, 0.0  ;;  %v1710_v38 = vpop.f32.mrb[14].mxu0  ;;  %v676_v14 = vmax.f32 %v634_v12, 0.0 }
 0x102   : > { %v564_v42 = vadd.f32 %v1710_v38, %v2038_v47  ;;  %v558_v43 = vpop.f32.mrb[15].mxu0  ;;  %v1734_v45 = vpop.f32.mrb[14].mxu1  ;;  %v675_v9 = vmax.f32 %v629_v6, 0.0 }
 0x103   : > { %v559_v44 = vadd.f32 %v2038_v47, %v558_v43  ;;  %1761 = vmatprep.mubr.msk.f32.mxu1 %vm325_vm0, %v659_v37  ;;  %v638_v50 = vpop.f32.mrb[15].mxu1  ;;  %v644_v15 = vadd.f32 %v1734_v45, %v2038_v47 }
 0x104   : > { %1762 = vmatmul.mubr.msk.f32.gmra.mrb[28].mxu1 %vm325_vm0, %v660_v41  ;;  %v662_v51 = vmax.f32 %v564_v42, 0.0  ;;  %v639_v10 = vadd.f32 %v2038_v47, %v638_v50 }
 0x105   : > { %v661_v46 = vmax.f32 %v559_v44, 0.0  ;;  %v678_v16 = vmax.f32 %v644_v15, 0.0 }
 0x106   : > { %v677_v13 = vmax.f32 %v639_v10, 0.0 }
 0x107   : > { %1764 = vmatprep.mubr.msk.f32.mxu1 %vm325_vm0, %v661_v46 }
 0x108   : > { %1765 = vmatmul.mubr.msk.f32.gmra.mrb[30].mxu1 %vm325_vm0, %v662_v51 }
 0x109   : > { %1767 = vmatprep.mubr.msk.f32.mxu1 %vm325_vm0, %v663_v48 }
 0x10c   : > { %1768 = vmatmul.mubr.msk.f32.gmra.mrb[32].mxu1 %vm325_vm0, %v664_v56 }
 0x10d   : > { %1770 = vmatprep.mubr.msk.f32.mxu1 %vm325_vm0, %v665_v54 }
 0x110   : > { %1771 = vmatmul.mubr.msk.f32.gmra.mrb[34].mxu1 %vm325_vm0, %v666_v59 }
 0x111   : > { %1773 = vmatprep.mubr.msk.f32.mxu1 %vm325_vm0, %v667_v58 }
 0x114   : > { %1774 = vmatmul.mubr.msk.f32.gmra.mrb[36].mxu1 %vm325_vm0, %v668_v0 }
 0x115   : > { %1776 = vmatprep.mubr.msk.f32.mxu1 %vm325_vm0, %v669_v62 }
 0x118   : > { %1777 = vmatmul.mubr.msk.f32.gmra.mrb[38].mxu1 %vm325_vm0, %v670_v3 }
 0x119   : > { %1779 = vmatprep.mubr.msk.f32.mxu1 %vm325_vm0, %v671_v1 }
 0x11c   : > { %1780 = vmatmul.mubr.msk.f32.gmra.mrb[40].mxu1 %vm325_vm0, %v672_v7 }
 0x11d   : > { %1782 = vmatprep.mubr.msk.f32.mxu1 %vm325_vm0, %v673_v5 }
 0x120   : > { %1783 = vmatmul.mubr.msk.f32.gmra.mrb[42].mxu1 %vm325_vm0, %v674_v11 }
 0x121   : > { %1785 = vmatprep.mubr.msk.f32.mxu1 %vm325_vm0, %v675_v9 }
 0x124   : > { %1786 = vmatmul.mubr.msk.f32.gmra.mrb[44].mxu1 %vm325_vm0, %v676_v14 }
 0x125   : > { %1788 = vmatprep.mubr.msk.f32.mxu1 %vm325_vm0, %v677_v13 }
 0x128   : > { %1789 = vmatmul.mubr.msk.f32.gmra.mrb[46].mxu1 %vm325_vm0, %v678_v16 }
 0x1bf   : > { %v1745_v18 = vpop.f32.mrb[16].mxu1 }
 0x1c0   : > { %v858_v19 = vadd.f32 %v1745_v18, %v2119_v17  ;;  %v852_v20 = vpop.f32.mrb[17].mxu1 }
 0x1c1   : > { %v853_v21 = vadd.f32 %v2119_v17, %v852_v20 }
 0x1c2   : > { %v1012_v23 = vmax.f32 %v858_v19, 0.0 }
 0x1c3   : > { %v1011_v47 = vmax.f32 %v853_v21, 0.0  ;;  %v1748_v22 = vpop.f32.mrb[18].mxu1 }
 0x1c4   : > { %v868_v24 = vadd.f32 %v1748_v22, %v2119_v17  ;;  %v862_v25 = vpop.f32.mrb[19].mxu1 }
 0x1c5   : > { %v863_v26 = vadd.f32 %v2119_v17, %v862_v25  ;;  %1795 = vmatprep.mubr.msk.f32.mxu0 %vm1052_vm1, %v1011_v47 }
 0x1c6   : > { %1796 = vmatmul.mubr.msk.f32.vlgmr.msra.gmra.mrb[16].mxu0 %vm1052_vm1, %v1012_v23  ;;  %v1014_v29 = vmax.f32 %v868_v24, 0.0 }
 0x1c7   : > { %v1013_v27 = vmax.f32 %v863_v26, 0.0  ;;  %v1751_v28 = vpop.f32.mrb[20].mxu1 }
 0x1c8   : > { %v878_v30 = vadd.f32 %v1751_v28, %v2119_v17  ;;  %v872_v31 = vpop.f32.mrb[21].mxu1 }
 0x1c9   : > { %v873_v32 = vadd.f32 %v2119_v17, %v872_v31  ;;  %1798 = vmatprep.mubr.msk.f32.mxu0 %vm1052_vm1, %v1013_v27 }
 0x1ca   : > { %1799 = vmatmul.mubr.msk.f32.gmra.mrb[18].mxu0 %vm1052_vm1, %v1014_v29  ;;  %v1016_v35 = vmax.f32 %v878_v30, 0.0 }
 0x1cb   : > { %v1015_v33 = vmax.f32 %v873_v32, 0.0  ;;  %v1754_v34 = vpop.f32.mrb[22].mxu1 }
 0x1cc   : > { %v888_v36 = vadd.f32 %v1754_v34, %v2119_v17  ;;  %v882_v37 = vpop.f32.mrb[23].mxu1 }
 0x1cd   : > { %v883_v38 = vadd.f32 %v2119_v17, %v882_v37  ;;  %1801 = vmatprep.mubr.msk.f32.mxu0 %vm1052_vm1, %v1015_v33 }
 0x1ce   : > { %1802 = vmatmul.mubr.msk.f32.gmra.mrb[20].mxu0 %vm1052_vm1, %v1016_v35  ;;  %v1018_v41 = vmax.f32 %v888_v36, 0.0 }
 0x1cf   : > { %v1017_v39 = vmax.f32 %v883_v38, 0.0  ;;  %v1757_v40 = vpop.f32.mrb[24].mxu1 }
 0x1d0   : > { %v898_v42 = vadd.f32 %v1757_v40, %v2119_v17  ;;  %v892_v43 = vpop.f32.mrb[25].mxu1 }
 0x1d1   : > { %v893_v44 = vadd.f32 %v2119_v17, %v892_v43  ;;  %1804 = vmatprep.mubr.msk.f32.mxu0 %vm1052_vm1, %v1017_v39 }
 0x1d2   : > { %1805 = vmatmul.mubr.msk.f32.gmra.mrb[22].mxu0 %vm1052_vm1, %v1018_v41  ;;  %v1020_v48 = vmax.f32 %v898_v42, 0.0 }
 0x1d3   : > { %v1019_v45 = vmax.f32 %v893_v44, 0.0  ;;  %v1760_v46 = vpop.f32.mrb[26].mxu1 }
 0x1d4   : > { %v908_v49 = vadd.f32 %v1760_v46, %v2119_v17  ;;  %v902_v50 = vpop.f32.mrb[27].mxu1 }
 0x1d5   : > { %v903_v51 = vadd.f32 %v2119_v17, %v902_v50  ;;  %1807 = vmatprep.mubr.msk.f32.mxu0 %vm1052_vm1, %v1019_v45 }
 0x1d6   : > { %1808 = vmatmul.mubr.msk.f32.gmra.mrb[24].mxu0 %vm1052_vm1, %v1020_v48  ;;  %v1022_v55 = vmax.f32 %v908_v49, 0.0 }
 0x1d7   : > { %v1021_v53 = vmax.f32 %v903_v51, 0.0  ;;  %v1763_v54 = vpop.f32.mrb[28].mxu1  ;;  %v2188_v51 = vld [vmem:[%s2302_s6] ss:$0 sm:$0xff] }
 0x1d8   : > { %v918_v56 = vadd.f32 %v1763_v54, %v2119_v17  ;;  %v912_v57 = vpop.f32.mrb[29].mxu1 }
 0x1d9   : > { %v913_v58 = vadd.f32 %v2119_v17, %v912_v57  ;;  %1810 = vmatprep.mubr.msk.f32.mxu0 %vm1052_vm1, %v1021_v53 }
 0x1da   : > { %1811 = vmatmul.mubr.msk.f32.gmra.mrb[26].mxu0 %vm1052_vm1, %v1022_v55  ;;  %v1024_v61 = vmax.f32 %v918_v56, 0.0 }
 0x1db   : > { %v1023_v52 = vmax.f32 %v913_v58, 0.0  ;;  %v1766_v59 = vpop.f32.mrb[30].mxu1 }
 0x1dc   : > { %v928_v62 = vadd.f32 %v1766_v59, %v2119_v17  ;;  %v922_v63 = vpop.f32.mrb[31].mxu1 }
 0x1dd   : > { %v923_v0 = vadd.f32 %v2119_v17, %v922_v63  ;;  %1813 = vmatprep.mubr.msk.f32.mxu0 %vm1052_vm1, %v1023_v52 }
 0x1de   : > { %1814 = vmatmul.mubr.msk.f32.gmra.mrb[28].mxu0 %vm1052_vm1, %v1024_v61  ;;  %v1026_v2 = vmax.f32 %v928_v62, 0.0 }
 0x1df   : > { %v1025_v60 = vmax.f32 %v923_v0, 0.0  ;;  %v1769_v1 = vpop.f32.mrb[32].mxu1 }
 0x1e0   : > { %v938_v3 = vadd.f32 %v1769_v1, %v2119_v17  ;;  %v932_v4 = vpop.f32.mrb[33].mxu1 }
 0x1e1   : > { %v933_v5 = vadd.f32 %v2119_v17, %v932_v4  ;;  %1816 = vmatprep.mubr.msk.f32.mxu0 %vm1052_vm1, %v1025_v60 }
 0x1e2   : > { %1817 = vmatmul.mubr.msk.f32.gmra.mrb[30].mxu0 %vm1052_vm1, %v1026_v2  ;;  %v1028_v8 = vmax.f32 %v938_v3, 0.0 }
 0x1e3   : > { %v1027_v6 = vmax.f32 %v933_v5, 0.0  ;;  %v1772_v7 = vpop.f32.mrb[34].mxu1 }
 0x1e4   : > { %v948_v9 = vadd.f32 %v1772_v7, %v2119_v17  ;;  %v942_v10 = vpop.f32.mrb[35].mxu1 }
 0x1e5   : > { %v943_v11 = vadd.f32 %v2119_v17, %v942_v10  ;;  %1819 = vmatprep.mubr.msk.f32.mxu0 %vm1052_vm1, %v1027_v6 }
 0x1e6   : > { %1820 = vmatmul.mubr.msk.f32.gmra.mrb[32].mxu0 %vm1052_vm1, %v1028_v8  ;;  %v1030_v14 = vmax.f32 %v948_v9, 0.0 }
 0x1e7   : > { %v1029_v12 = vmax.f32 %v943_v11, 0.0  ;;  %v1775_v13 = vpop.f32.mrb[36].mxu1 }
 0x1e8   : > { %v958_v15 = vadd.f32 %v1775_v13, %v2119_v17  ;;  %v952_v16 = vpop.f32.mrb[37].mxu1 }
 0x1e9   : > { %v953_v18 = vadd.f32 %v2119_v17, %v952_v16  ;;  %1822 = vmatprep.mubr.msk.f32.mxu0 %vm1052_vm1, %v1029_v12 }
 0x1ea   : > { %1823 = vmatmul.mubr.msk.f32.gmra.mrb[34].mxu0 %vm1052_vm1, %v1030_v14  ;;  %v1032_v21 = vmax.f32 %v958_v15, 0.0 }
 0x1eb   : > { %v1031_v19 = vmax.f32 %v953_v18, 0.0  ;;  %v1778_v20 = vpop.f32.mrb[38].mxu1 }
 0x1ec   : > { %v968_v47 = vadd.f32 %v1778_v20, %v2119_v17  ;;  %v962_v22 = vpop.f32.mrb[39].mxu1 }
 0x1ed   : > { %v963_v23 = vadd.f32 %v2119_v17, %v962_v22  ;;  %1825 = vmatprep.mubr.msk.f32.mxu0 %vm1052_vm1, %v1031_v19 }
 0x1ee   : > { %1826 = vmatmul.mubr.msk.f32.gmra.mrb[36].mxu0 %vm1052_vm1, %v1032_v21  ;;  %v1034_v26 = vmax.f32 %v968_v47, 0.0 }
 0x1ef   : > { %v1033_v24 = vmax.f32 %v963_v23, 0.0  ;;  %v1781_v25 = vpop.f32.mrb[40].mxu1 }
 0x1f0   : > { %v978_v27 = vadd.f32 %v1781_v25, %v2119_v17  ;;  %v972_v28 = vpop.f32.mrb[41].mxu1 }
 0x1f1   : > { %v973_v29 = vadd.f32 %v2119_v17, %v972_v28  ;;  %1828 = vmatprep.mubr.msk.f32.mxu0 %vm1052_vm1, %v1033_v24 }
 0x1f2   : > { %1829 = vmatmul.mubr.msk.f32.gmra.mrb[38].mxu0 %vm1052_vm1, %v1034_v26  ;;  %v1036_v32 = vmax.f32 %v978_v27, 0.0 }
 0x1f3   : > { %v1035_v30 = vmax.f32 %v973_v29, 0.0  ;;  %v1784_v31 = vpop.f32.mrb[42].mxu1 }
 0x1f4   : > { %v988_v33 = vadd.f32 %v1784_v31, %v2119_v17  ;;  %v982_v34 = vpop.f32.mrb[43].mxu1 }
 0x1f5   : > { %v983_v35 = vadd.f32 %v2119_v17, %v982_v34  ;;  %1831 = vmatprep.mubr.msk.f32.mxu0 %vm1052_vm1, %v1035_v30 }
 0x1f6   : > { %1832 = vmatmul.mubr.msk.f32.gmra.mrb[40].mxu0 %vm1052_vm1, %v1036_v32  ;;  %v1038_v38 = vmax.f32 %v988_v33, 0.0 }
 0x1f7   : > { %v1037_v36 = vmax.f32 %v983_v35, 0.0  ;;  %v1787_v37 = vpop.f32.mrb[44].mxu1 }
 0x1f8   : > { %v998_v39 = vadd.f32 %v1787_v37, %v2119_v17  ;;  %v992_v40 = vpop.f32.mrb[45].mxu1 }
 0x1f9   : > { %v993_v41 = vadd.f32 %v2119_v17, %v992_v40  ;;  %1834 = vmatprep.mubr.msk.f32.mxu0 %vm1052_vm1, %v1037_v36 }
 0x1fa   : > { %1835 = vmatmul.mubr.msk.f32.gmra.mrb[42].mxu0 %vm1052_vm1, %v1038_v38  ;;  %v1040_v44 = vmax.f32 %v998_v39, 0.0 }
 0x1fb   : > { %v1039_v42 = vmax.f32 %v993_v41, 0.0  ;;  %v1790_v43 = vpop.f32.mrb[46].mxu1 }
 0x1fc   : > { %v1008_v45 = vadd.f32 %v1790_v43, %v2119_v17  ;;  %v1002_v46 = vpop.f32.mrb[47].mxu1 }
 0x1fd   : > { %v1003_v48 = vadd.f32 %v2119_v17, %v1002_v46  ;;  %1837 = vmatprep.mubr.msk.f32.mxu0 %vm1052_vm1, %v1039_v42 }
 0x1fe   : > { %1838 = vmatmul.mubr.msk.f32.gmra.mrb[44].mxu0 %vm1052_vm1, %v1040_v44  ;;  %v1042_v50 = vmax.f32 %v1008_v45, 0.0 }
 0x1ff   : > { %v1041_v49 = vmax.f32 %v1003_v48, 0.0 }
 0x201   : > { %1840 = vmatprep.mubr.msk.f32.mxu0 %vm1052_vm1, %v1041_v49 }
 0x202   : > { %1841 = vmatmul.mubr.msk.f32.gmra.mrb[46].mxu0 %vm1052_vm1, %v1042_v50 }
 0x299   : > { %v1797_v17 = vpop.f32.mrb[16].mxu0 }
 0x29a   : > { %v1221_v53 = vadd.f32 %v1797_v17, %v2188_v51  ;;  %v1215_v54 = vpop.f32.mrb[17].mxu0 }
 0x29b   : > { %v1216_v55 = vadd.f32 %v2188_v51, %v1215_v54 }
 0x29c   : > { %1376 = vst.msk [vmem:[%s2195_s15 + $0x8] sm:$0xff] %vm1374_vm2, %v1221_v53 }
 0x29d   : > { %1375 = vst.msk [vmem:[%s2195_s15] sm:$0xff] %vm1374_vm2, %v1216_v55  ;;  %v1800_v56 = vpop.f32.mrb[18].mxu0 }
 0x29e   : > { %v1231_v57 = vadd.f32 %v1800_v56, %v2188_v51  ;;  %v1225_v58 = vpop.f32.mrb[19].mxu0 }
 0x29f   : > { %v1226_v52 = vadd.f32 %v2188_v51, %v1225_v58 }
 0x2a0   : > { %1378 = vst.msk [vmem:[%s2195_s15 + $0x18] sm:$0xff] %vm1374_vm2, %v1231_v57 }
 0x2a1   : > { %1377 = vst.msk [vmem:[%s2195_s15 + $0x10] sm:$0xff] %vm1374_vm2, %v1226_v52  ;;  %v1803_v59 = vpop.f32.mrb[20].mxu0 }
 0x2a2   : > { %v1241_v61 = vadd.f32 %v1803_v59, %v2188_v51  ;;  %v1235_v62 = vpop.f32.mrb[21].mxu0 }
 0x2a3   : > { %v1236_v63 = vadd.f32 %v2188_v51, %v1235_v62 }
 0x2a4   : > { %1380 = vst.msk [vmem:[%s2195_s15 + $0x28] sm:$0xff] %vm1374_vm2, %v1241_v61 }
 0x2a5   : > { %1379 = vst.msk [vmem:[%s2195_s15 + $0x20] sm:$0xff] %vm1374_vm2, %v1236_v63  ;;  %v1806_v0 = vpop.f32.mrb[22].mxu0 }
 0x2a6   : > { %v1251_v60 = vadd.f32 %v1806_v0, %v2188_v51  ;;  %v1245_v1 = vpop.f32.mrb[23].mxu0 }
 0x2a7   : > { %v1246_v2 = vadd.f32 %v2188_v51, %v1245_v1 }
 0x2a8   : > { %1382 = vst.msk [vmem:[%s2195_s15 + $0x38] sm:$0xff] %vm1374_vm2, %v1251_v60 }
 0x2a9   : > { %1381 = vst.msk [vmem:[%s2195_s15 + $0x30] sm:$0xff] %vm1374_vm2, %v1246_v2  ;;  %v1809_v3 = vpop.f32.mrb[24].mxu0 }
 0x2aa   : > { %v1261_v4 = vadd.f32 %v1809_v3, %v2188_v51  ;;  %v1255_v5 = vpop.f32.mrb[25].mxu0 }
 0x2ab   : > { %v1256_v6 = vadd.f32 %v2188_v51, %v1255_v5 }
 0x2ac   : > { %1384 = vst.msk [vmem:[%s2195_s15 + $0x48] sm:$0xff] %vm1374_vm2, %v1261_v4 }
 0x2ad   : > { %1383 = vst.msk [vmem:[%s2195_s15 + $0x40] sm:$0xff] %vm1374_vm2, %v1256_v6  ;;  %v1812_v7 = vpop.f32.mrb[26].mxu0 }
 0x2ae   : > { %v1271_v8 = vadd.f32 %v1812_v7, %v2188_v51  ;;  %v1265_v9 = vpop.f32.mrb[27].mxu0 }
 0x2af   : > { %v1266_v10 = vadd.f32 %v2188_v51, %v1265_v9 }
 0x2b0   : > { %1386 = vst.msk [vmem:[%s2195_s15 + $0x58] sm:$0xff] %vm1374_vm2, %v1271_v8 }
 0x2b1   : > { %1385 = vst.msk [vmem:[%s2195_s15 + $0x50] sm:$0xff] %vm1374_vm2, %v1266_v10  ;;  %v1815_v11 = vpop.f32.mrb[28].mxu0 }
 0x2b2   : > { %v1281_v12 = vadd.f32 %v1815_v11, %v2188_v51  ;;  %v1275_v13 = vpop.f32.mrb[29].mxu0 }
 0x2b3   : > { %v1276_v14 = vadd.f32 %v2188_v51, %v1275_v13 }
 0x2b4   : > { %1388 = vst.msk [vmem:[%s2195_s15 + $0x68] sm:$0xff] %vm1374_vm2, %v1281_v12 }
 0x2b5   : > { %1387 = vst.msk [vmem:[%s2195_s15 + $0x60] sm:$0xff] %vm1374_vm2, %v1276_v14  ;;  %v1818_v15 = vpop.f32.mrb[30].mxu0 }
 0x2b6   : > { %v1291_v16 = vadd.f32 %v1818_v15, %v2188_v51  ;;  %v1285_v18 = vpop.f32.mrb[31].mxu0 }
 0x2b7   : > { %v1286_v19 = vadd.f32 %v2188_v51, %v1285_v18 }
 0x2b8   : > { %1390 = vst.msk [vmem:[%s2195_s15 + $0x78] sm:$0xff] %vm1374_vm2, %v1291_v16 }
 0x2b9   : > { %1389 = vst.msk [vmem:[%s2195_s15 + $0x70] sm:$0xff] %vm1374_vm2, %v1286_v19  ;;  %v1821_v20 = vpop.f32.mrb[32].mxu0 }
 0x2ba   : > { %v1301_v21 = vadd.f32 %v1821_v20, %v2188_v51  ;;  %v1295_v47 = vpop.f32.mrb[33].mxu0 }
 0x2bb   : > { %v1296_v22 = vadd.f32 %v2188_v51, %v1295_v47 }
 0x2bc   : > { %1392 = vst.msk [vmem:[%s2195_s15 + $0x88] sm:$0xff] %vm1374_vm2, %v1301_v21 }
 0x2bd   : > { %1391 = vst.msk [vmem:[%s2195_s15 + $0x80] sm:$0xff] %vm1374_vm2, %v1296_v22  ;;  %v1824_v23 = vpop.f32.mrb[34].mxu0 }
 0x2be   : > { %v1311_v24 = vadd.f32 %v1824_v23, %v2188_v51  ;;  %v1305_v25 = vpop.f32.mrb[35].mxu0 }
 0x2bf   : > { %v1306_v26 = vadd.f32 %v2188_v51, %v1305_v25 }
 0x2c0   : > { %1394 = vst.msk [vmem:[%s2195_s15 + $0x98] sm:$0xff] %vm1374_vm2, %v1311_v24 }
 0x2c1   : > { %1393 = vst.msk [vmem:[%s2195_s15 + $0x90] sm:$0xff] %vm1374_vm2, %v1306_v26  ;;  %v1827_v27 = vpop.f32.mrb[36].mxu0 }
 0x2c2   : > { %v1321_v28 = vadd.f32 %v1827_v27, %v2188_v51  ;;  %v1315_v29 = vpop.f32.mrb[37].mxu0 }
 0x2c3   : > { %v1316_v30 = vadd.f32 %v2188_v51, %v1315_v29 }
 0x2c4   : > { %1396 = vst.msk [vmem:[%s2195_s15 + $0xa8] sm:$0xff] %vm1374_vm2, %v1321_v28 }
 0x2c5   : > { %1395 = vst.msk [vmem:[%s2195_s15 + $0xa0] sm:$0xff] %vm1374_vm2, %v1316_v30  ;;  %v1830_v31 = vpop.f32.mrb[38].mxu0 }
 0x2c6   : > { %v1331_v32 = vadd.f32 %v1830_v31, %v2188_v51  ;;  %v1325_v33 = vpop.f32.mrb[39].mxu0 }
 0x2c7   : > { %v1326_v34 = vadd.f32 %v2188_v51, %v1325_v33 }
 0x2c8   : > { %1398 = vst.msk [vmem:[%s2195_s15 + $0xb8] sm:$0xff] %vm1374_vm2, %v1331_v32 }
 0x2c9   : > { %1397 = vst.msk [vmem:[%s2195_s15 + $0xb0] sm:$0xff] %vm1374_vm2, %v1326_v34  ;;  %v1833_v35 = vpop.f32.mrb[40].mxu0 }
 0x2ca   : > { %v1341_v36 = vadd.f32 %v1833_v35, %v2188_v51  ;;  %v1335_v37 = vpop.f32.mrb[41].mxu0 }
 0x2cb   : > { %v1336_v38 = vadd.f32 %v2188_v51, %v1335_v37 }
 0x2cc   : > { %1400 = vst.msk [vmem:[%s2195_s15 + $0xc8] sm:$0xff] %vm1374_vm2, %v1341_v36 }
 0x2cd   : > { %1399 = vst.msk [vmem:[%s2195_s15 + $0xc0] sm:$0xff] %vm1374_vm2, %v1336_v38  ;;  %v1836_v39 = vpop.f32.mrb[42].mxu0 }
 0x2ce   : > { %v1351_v40 = vadd.f32 %v1836_v39, %v2188_v51  ;;  %v1345_v41 = vpop.f32.mrb[43].mxu0 }
 0x2cf   : > { %v1346_v42 = vadd.f32 %v2188_v51, %v1345_v41 }
 0x2d0   : > { %1402 = vst.msk [vmem:[%s2195_s15 + $0xd8] sm:$0xff] %vm1374_vm2, %v1351_v40 }
 0x2d1   : > { %1401 = vst.msk [vmem:[%s2195_s15 + $0xd0] sm:$0xff] %vm1374_vm2, %v1346_v42  ;;  %v1839_v43 = vpop.f32.mrb[44].mxu0 }
 0x2d2   : > { %v1361_v44 = vadd.f32 %v1839_v43, %v2188_v51  ;;  %v1355_v45 = vpop.f32.mrb[45].mxu0 }
 0x2d3   : > { %v1356_v46 = vadd.f32 %v2188_v51, %v1355_v45 }
 0x2d4   : > { %1404 = vst.msk [vmem:[%s2195_s15 + $0xe8] sm:$0xff] %vm1374_vm2, %v1361_v44 }
 0x2d5   : > { %1403 = vst.msk [vmem:[%s2195_s15 + $0xe0] sm:$0xff] %vm1374_vm2, %v1356_v46  ;;  %v1842_v48 = vpop.f32.mrb[46].mxu0 }
 0x2d6   : > { %v1371_v49 = vadd.f32 %v1842_v48, %v2188_v51  ;;  %v1365_v50 = vpop.f32.mrb[47].mxu0 }
 0x2d7   : > { %v1366_v17 = vadd.f32 %v2188_v51, %v1365_v50 }
 0x2d8   : > { %1406 = vst.msk [vmem:[%s2195_s15 + $0xf8] sm:$0xff] %vm1374_vm2, %v1371_v49 }
 0x2d9   : > { %1405 = vst.msk [vmem:[%s2195_s15 + $0xf0] sm:$0xff] %vm1374_vm2, %v1366_v17 }
 0x2da PF: > { %s17_s24 = sadd.s32 1, %s1881_s24  }
 0x2db   : > { %p14_p4 = scmp.ge.s32.totalorder %s17_s24, 4  }
 0x2dd   :  { %16 = sbr.rel (!%p14_p4) target bundleno = 1 (0x1), region = 78 }

</bundles_post_ra>
